<compile_context>
chip_gen: v6e
topology: v6e:2x2x1
jax: 0.10.0
libtpu: 0.0.40
codegen_flags: <defaults>
</compile_context>

<pallas_src>
import functools

import jax
import jax.numpy as jnp
from jax.experimental import pallas as pl
from jax.experimental.pallas import tpu as pltpu


def _round_up(x, m):
    return (x + m - 1) // m * m


def _choose_token_tile(n_tokens, dim, num_experts, x_bytes,
                       max_tile=1024, vmem_budget=20 * 1024 * 1024):
    """Largest multiple-of-8 token tile whose double-buffered footprint fits
    in a conservative VMEM budget (safe on v5e/v6e/v7x default scoped VMEM)."""
    tile = _round_up(min(max_tile, _round_up(n_tokens, 8)), 8)

    def need(t):
        x_buf = 2 * t * dim * x_bytes                      # double-buffered x tile
        w_buf = num_experts * dim * x_bytes + 4 * num_experts
        inter = 8 * t * num_experts * 4                    # f32 logits/mask/out
        return x_buf + w_buf + inter

    while tile > 8 and need(tile) > vmem_budget:
        tile = max(8, _round_up(tile // 2, 8))
    return tile


def _switch_gate_pass1_kernel(x_ref, w_ref, b_ref, masked_ref, pdenom_ref,
                              *, n_tokens, tile_m):
    i = pl.program_id(0)

    x = x_ref[...]                                    # [TM, D] native dtype
    w = w_ref[...]                                    # [E,  D] native dtype
    b = b_ref[...].astype(jnp.float32)                # [1,  E]

    # logits = x @ W^T + b  (contract D on the MXU; no f32 upcast of x/W).
    logits = jax.lax.dot_general(
        x, w, dimension_numbers=(((1,), (1,)), ((), ())),
        preferred_element_type=jnp.float32) + b       # [TM, E]

    tm, n_exp = logits.shape

    # Top-1 directly on logits (softmax is monotone); first-index tie-break
    # matches torch.topk.
    col = jax.lax.broadcasted_iota(jnp.int32, (tm, n_exp), 1)
    lmax = jnp.max(logits, axis=-1, keepdims=True)
    cand = jnp.where(logits == lmax, col, n_exp)
    top_idx = jnp.min(cand, axis=-1, keepdims=True)   # [TM, 1]
    mask = (col == top_idx).astype(jnp.float32)       # [TM, E]

    # Kept softmax value == 1 / sum(exp(logits - rowmax)); skips the full
    # softmax (saves an [TM,E] divide and a second [TM,E] max).
    sumexp = jnp.sum(jnp.exp(logits - lmax), axis=-1, keepdims=True)   # [TM,1]
    top_val = pl.reciprocal(sumexp, approx=False)

    # Zero padded rows (last tile when TM does not divide N) so they neither
    # appear in the output nor pollute the global denominator.
    row = jax.lax.broadcasted_iota(jnp.int32, (tm, n_exp), 0)
    valid = (row + i * tile_m) < n_tokens
    masked = jnp.where(valid, mask * top_val, 0.0)

    masked_ref[...] = masked.astype(masked_ref.dtype)

    # Per-tile partial per-expert denominator, stored in row 0 of this tile's
    # [8, E] slot (rows 1..7 zero) so the output block stays sublane-aligned.
    psum = jnp.sum(masked, axis=0, keepdims=True)                      # [1, E]
    rowz = jax.lax.broadcasted_iota(jnp.int32, (8, n_exp), 0)
    pdenom_ref[...] = jnp.where(rowz == 0,
                                jnp.broadcast_to(psum, (8, n_exp)),
                                0.0)


def _switch_gate_pass2_kernel(denom_ref, masked_ref, out_ref,
                              *, capacity, epsilon):
    # Fold capacity and epsilon into one per-expert scale: a single [1,E]
    # reciprocal instead of an [N,E] divide, then one broadcast multiply.
    denom = denom_ref[...].astype(jnp.float32) + epsilon          # [1, E]
    scale = capacity * pl.reciprocal(denom, approx=False)         # [1, E]
    out_ref[...] = (masked_ref[...].astype(jnp.float32) * scale).astype(
        out_ref.dtype)


def switch_gate(x, w_gate_weight, w_gate_bias, capacity_factor=1.0,
                epsilon=1e-6, use_aux_loss=False, max_tile=1024):
    """x: [N, dim]; w_gate_weight: [num_experts, dim] (PyTorch Linear layout);
    w_gate_bias: [num_experts]."""
    n_tok, dim = x.shape
    num_experts = w_gate_weight.shape[0]
    out_dtype = x.dtype

    # capacity = int(capacity_factor * x.size(0))
    capacity = int(capacity_factor * n_tok)

    x_bytes = jnp.dtype(x.dtype).itemsize
    tile = _choose_token_tile(n_tok, dim, num_experts, x_bytes,
                              max_tile=max_tile)
    n_tiles = pl.cdiv(n_tok, tile)
    n_pad = n_tiles * tile

    x_in = x if n_pad == n_tok else jnp.pad(x, ((0, n_pad - n_tok), (0, 0)))
    b2 = w_gate_bias.reshape(1, num_experts)

    cparams = pltpu.CompilerParams(
        dimension_semantics=("parallel",),
        vmem_limit_bytes=32 * 1024 * 1024)

    pass1 = functools.partial(
        _switch_gate_pass1_kernel, n_tokens=n_tok, tile_m=tile)
    masked, pdenom = pl.pallas_call(
        pass1,
        out_shape=(
            jax.ShapeDtypeStruct((n_pad, num_experts), jnp.float32),
            jax.ShapeDtypeStruct((8 * n_tiles, num_experts), jnp.float32),
        ),
        grid=(n_tiles,),
        in_specs=[
            pl.BlockSpec((tile, dim), lambda i: (i, 0)),           # x: tiled/pipelined
            pl.BlockSpec((num_experts, dim), lambda i: (0, 0)),    # W: VMEM-resident
            pl.BlockSpec((1, num_experts), lambda i: (0, 0)),      # b: VMEM-resident
        ],
        out_specs=(
            pl.BlockSpec((tile, num_experts), lambda i: (i, 0)),
            pl.BlockSpec((8, num_experts), lambda i: (i, 0)),
        ),
        compiler_params=cparams,
    )(x_in, w_gate_weight, b2)

    # Tiny [8*n_tiles, E] -> [1, E] reduction of the per-tile partials.
    denom = jnp.sum(pdenom, axis=0, keepdims=True)

    pass2 = functools.partial(
        _switch_gate_pass2_kernel,
        capacity=float(capacity), epsilon=float(epsilon))
    out = pl.pallas_call(
        pass2,
        out_shape=jax.ShapeDtypeStruct((n_pad, num_experts), out_dtype),
        grid=(n_tiles,),
        in_specs=[
            pl.BlockSpec((1, num_experts), lambda i: (0, 0)),      # denom: resident
            pl.BlockSpec((tile, num_experts), lambda i: (i, 0)),   # masked: tiled
        ],
        out_specs=pl.BlockSpec((tile, num_experts), lambda i: (i, 0)),
        compiler_params=cparams,
    )(denom, masked)

    gate_scores = out if n_pad == n_tok else out[:n_tok]

    if use_aux_loss:
        # TODO(synk): mirrors the PyTorch original including its shape bug —
        # (load - importance) only broadcasts when n_tokens == num_experts.
        load = gate_scores.sum(0)
        importance = gate_scores.sum(1)
        loss = jnp.mean((load - importance) ** 2)
        return gate_scores, loss
    return gate_scores, None


def _reference(x, w, b, capacity_factor=1.0, epsilon=1e-6):
    # Pure-JAX reference mirroring the PyTorch forward.
    logits = x @ w.T + b
    gate = jax.nn.softmax(logits, axis=-1)
    capacity = int(capacity_factor * x.shape[0])
    idx = jnp.argmax(gate, axis=-1)
    mask = jax.nn.one_hot(idx, gate.shape[-1], dtype=gate.dtype)
    masked = gate * mask
    denom = masked.sum(0, keepdims=True) + epsilon
    return masked / denom * capacity


if __name__ == "__main__":
    key = jax.random.PRNGKey(0)
    k_x, k_w, k_b, k_x2 = jax.random.split(key, 4)

    dim = 32
    num_experts = 4
    bound = 1.0 / (dim ** 0.5)
    w_gate_weight = jax.random.uniform(
        k_w, (num_experts, dim), minval=-bound, maxval=bound, dtype=jnp.float32)
    w_gate_bias = jax.random.uniform(
        k_b, (num_experts,), minval=-bound, maxval=bound, dtype=jnp.float32)

    # Case 1: small single-tile shape (capacity = 8).
    n_tokens = 8
    x = jax.random.normal(k_x, (n_tokens, dim), dtype=jnp.float32)
    gate_scores, aux = switch_gate(x, w_gate_weight, w_gate_bias)
    gate_scores = jax.block_until_ready(gate_scores)
    ref = _reference(x, w_gate_weight, w_gate_bias)
    assert gate_scores.shape == (n_tokens, num_experts)
    assert jnp.allclose(gate_scores, ref, atol=1e-4, rtol=1e-4), (
        "mismatch vs reference (single tile)")
    assert aux is None

    # Case 2: multi-tile path with padding (20 tokens, forced 8-row tiles).
    n_tokens2 = 20
    x2 = jax.random.normal(k_x2, (n_tokens2, dim), dtype=jnp.float32)
    gate_scores2, _ = switch_gate(x2, w_gate_weight, w_gate_bias, max_tile=8)
    gate_scores2 = jax.block_until_ready(gate_scores2)
    ref2 = _reference(x2, w_gate_weight, w_gate_bias)
    assert gate_scores2.shape == (n_tokens2, num_experts)
    assert jnp.allclose(gate_scores2, ref2, atol=1e-4, rtol=1e-4), (
        "mismatch vs reference (multi-tile / padded)")

    print("KERNEL_OK")
</pallas_src>

<mosaic_0001>
module attributes {stable_mosaic.version = 11 : i64} {
  func.func @_switch_gate_pass1_kernel(%arg0: i32, %arg1: memref<8x32xf32, #tpu.memory_space<vmem>>, %arg2: memref<4x32xf32, #tpu.memory_space<vmem>>, %arg3: memref<1x4xf32, #tpu.memory_space<vmem>>, %arg4: memref<8x4xf32, #tpu.memory_space<vmem>>, %arg5: memref<8x4xf32, #tpu.memory_space<vmem>>) attributes {dimension_semantics = [#tpu.dimension_semantics<parallel>], iteration_bounds = array<i64: 1>, scalar_prefetch = 0 : i64, scratch_operands = 0 : i64, tpu.core_type = #tpu.core_type<tc>, window_params = [{transform_indices = @transform_0, window_bounds = array<i64: 8, 32>}, {pipeline_mode = #tpu.pipeline_mode<synchronous>, transform_indices = @transform_1, window_bounds = array<i64: 4, 32>}, {pipeline_mode = #tpu.pipeline_mode<synchronous>, transform_indices = @transform_2, window_bounds = array<i64: 1, 4>}, {transform_indices = @transform_3, window_bounds = array<i64: 8, 4>}, {transform_indices = @transform_4, window_bounds = array<i64: 8, 4>}]} {
    %c0 = arith.constant 0 : index
    %c0_0 = arith.constant 0 : index
    %0 = vector.load %arg1[%c0, %c0_0] : memref<8x32xf32, #tpu.memory_space<vmem>>, vector<8x32xf32>
    %c0_1 = arith.constant 0 : index
    %c0_2 = arith.constant 0 : index
    %1 = vector.load %arg2[%c0_1, %c0_2] : memref<4x32xf32, #tpu.memory_space<vmem>>, vector<4x32xf32>
    %c0_3 = arith.constant 0 : index
    %c0_4 = arith.constant 0 : index
    %2 = vector.load %arg3[%c0_3, %c0_4] : memref<1x4xf32, #tpu.memory_space<vmem>>, vector<1x4xf32>
    %cst = arith.constant dense<0.000000e+00> : vector<8x4xf32>
    %3 = tpu.matmul %0, %1, %cst {dimension_numbers = #tpu.dot_dimension_numbers<[1], [1], [0], [0], [0, 0, 1, 0], [], []>} : vector<8x32xf32>, vector<4x32xf32>, vector<8x4xf32> -> vector<8x4xf32>
    %4 = vector.broadcast %2 : vector<1x4xf32> to vector<8x4xf32>
    %5 = arith.addf %3, %4 : vector<8x4xf32>
    %6 = tpu.iota {dimensions = array<i32: 1>} : vector<8x4xi32>
    %cst_5 = arith.constant dense<0xFF800000> : vector<8xf32>
    %7 = vector.multi_reduction <maximumf>, %5, %cst_5 [1] : vector<8x4xf32> to vector<8xf32>
    %8 = vector.shape_cast %7 : vector<8xf32> to vector<8x1xf32>
    %9 = vector.broadcast %8 : vector<8x1xf32> to vector<8x4xf32>
    %10 = arith.cmpf oeq, %5, %9 : vector<8x4xf32>
    %c4_i32 = arith.constant 4 : i32
    %11 = vector.broadcast %c4_i32 : i32 to vector<8x4xi32>
    %12 = arith.select %10, %6, %11 : vector<8x4xi1>, vector<8x4xi32>
    %cst_6 = arith.constant dense<2147483647> : vector<8xi32>
    %13 = vector.multi_reduction <minsi>, %12, %cst_6 [1] : vector<8x4xi32> to vector<8xi32>
    %14 = vector.shape_cast %13 : vector<8xi32> to vector<8x1xi32>
    %15 = vector.broadcast %14 : vector<8x1xi32> to vector<8x4xi32>
    %16 = arith.cmpi eq, %6, %15 : vector<8x4xi32>
    %17 = arith.extui %16 : vector<8x4xi1> to vector<8x4xi32>
    %18 = arith.sitofp %17 : vector<8x4xi32> to vector<8x4xf32>
    %19 = vector.broadcast %8 : vector<8x1xf32> to vector<8x4xf32>
    %20 = arith.subf %5, %19 : vector<8x4xf32>
    %21 = math.exp %20 : vector<8x4xf32>
    %cst_7 = arith.constant dense<0.000000e+00> : vector<8xf32>
    %22 = vector.multi_reduction <add>, %21, %cst_7 [1] : vector<8x4xf32> to vector<8xf32>
    %23 = vector.shape_cast %22 : vector<8xf32> to vector<8x1xf32>
    %24 = tpu.reciprocal %23 : vector<8x1xf32> -> vector<8x1xf32>
    %25 = tpu.iota {dimensions = array<i32: 0>} : vector<8x4xi32>
    %c8_i32 = arith.constant 8 : i32
    %26 = arith.muli %arg0, %c8_i32 : i32
    %27 = vector.broadcast %26 : i32 to vector<8x4xi32>
    %28 = arith.addi %25, %27 : vector<8x4xi32>
    %c8_i32_8 = arith.constant 8 : i32
    %29 = vector.broadcast %c8_i32_8 : i32 to vector<8x4xi32>
    %30 = arith.cmpi slt, %28, %29 : vector<8x4xi32>
    %31 = vector.broadcast %24 : vector<8x1xf32> to vector<8x4xf32>
    %32 = arith.mulf %18, %31 : vector<8x4xf32>
    %cst_9 = arith.constant 0.000000e+00 : f32
    %33 = vector.broadcast %cst_9 : f32 to vector<8x4xf32>
    %34 = arith.select %30, %32, %33 : vector<8x4xi1>, vector<8x4xf32>
    %c0_10 = arith.constant 0 : index
    %c0_11 = arith.constant 0 : index
    %35 = vector.load %arg4[%c0_10, %c0_11] : memref<8x4xf32, #tpu.memory_space<vmem>>, vector<8x4xf32>
    tpu.vector_store %arg4[%c0_10, %c0_11], %34 {strides = array<i32>} : memref<8x4xf32, #tpu.memory_space<vmem>>, vector<8x4xf32>,
    %cst_12 = arith.constant dense<0.000000e+00> : vector<4xf32>
    %36 = vector.multi_reduction <add>, %34, %cst_12 [0] : vector<8x4xf32> to vector<4xf32>
    %37 = vector.shape_cast %36 : vector<4xf32> to vector<1x4xf32>
    %38 = tpu.iota {dimensions = array<i32: 0>} : vector<8x4xi32>
    %c0_i32 = arith.constant 0 : i32
    %39 = vector.broadcast %c0_i32 : i32 to vector<8x4xi32>
    %40 = arith.cmpi eq, %38, %39 : vector<8x4xi32>
    %41 = vector.shape_cast %37 : vector<1x4xf32> to vector<1x4xf32>
    %42 = vector.broadcast %41 : vector<1x4xf32> to vector<8x4xf32>
    %cst_13 = arith.constant 0.000000e+00 : f32
    %43 = vector.broadcast %cst_13 : f32 to vector<8x4xf32>
    %44 = arith.select %40, %42, %43 : vector<8x4xi1>, vector<8x4xf32>
    %c0_14 = arith.constant 0 : index
    %c0_15 = arith.constant 0 : index
    %45 = vector.load %arg5[%c0_14, %c0_15] : memref<8x4xf32, #tpu.memory_space<vmem>>, vector<8x4xf32>
    tpu.vector_store %arg5[%c0_14, %c0_15], %44 {strides = array<i32>} : memref<8x4xf32, #tpu.memory_space<vmem>>, vector<8x4xf32>,
    return
  }
  func.func @transform_0(%arg0: i32) -> (i32, i32) {
    %c0_i32 = arith.constant 0 : i32
    %c0_i32_0 = arith.constant 0 : i32
    return %arg0, %c0_i32 : i32, i32
  }
  func.func @transform_1(%arg0: i32) -> (i32, i32) {
    %c0_i32 = arith.constant 0 : i32
    %c0_i32_0 = arith.constant 0 : i32
    %c0_i32_1 = arith.constant 0 : i32
    return %c0_i32, %c0_i32_0 : i32, i32
  }
  func.func @transform_2(%arg0: i32) -> (i32, i32) {
    %c0_i32 = arith.constant 0 : i32
    %c0_i32_0 = arith.constant 0 : i32
    %c0_i32_1 = arith.constant 0 : i32
    return %c0_i32, %c0_i32_0 : i32, i32
  }
  func.func @transform_3(%arg0: i32) -> (i32, i32) {
    %c0_i32 = arith.constant 0 : i32
    %c0_i32_0 = arith.constant 0 : i32
    return %arg0, %c0_i32 : i32, i32
  }
  func.func @transform_4(%arg0: i32) -> (i32, i32) {
    %c0_i32 = arith.constant 0 : i32
    %c0_i32_0 = arith.constant 0 : i32
    return %arg0, %c0_i32 : i32, i32
  }
}

</mosaic_0001>

<bundles_post_ra>
// kernel: tpu_custom_call.1
= control target key start
LH: loop header
LB: loop body
LE: loop exit
PB: predicated region body
PF: predicated region fallthrough
CT: control target
= control target key end

     0   :  { %10 = vsyncpa [#allocation3], 0  ;;  %s301_s0 = inlined_call_operand.hbm [shape: f32[8,32], index: 0, kind: input, shape index: {}]   ;;  %s302_s1 = inlined_call_operand.hbm [shape: f32[4,32], index: 1, kind: input, shape index: {}]   ;;  %s303_s2 = inlined_call_operand.vmem [shape: f32[1,4], index: 2, kind: input, shape index: {}]   ;;  %s304_s3 = inlined_call_operand.vmem [shape: f32[8,4], index: 3, kind: output, shape index: {0}]   ;;  %s305_s4 = inlined_call_operand.vmem [shape: f32[8,4], index: 4, kind: output, shape index: {1}]  }
   0x1   :  { %11 = vsyncpa [#allocation5], 0  ;;  %s251_s15 = smov [#allocation2]   ;;  %s252_s17 = smov [#allocation4]  }
   0x2   :  { %s18_s16 = sshll.u32 %s251_s15, 4  ;;  %s28_s18 = sshll.u32 %s252_s17, 4  ;;  %s19_s16 = int_to_ptr.vmem [resolvable:$true] %s18_s16  ;;  %s29_s18 = int_to_ptr.vmem [resolvable:$true] %s28_s18 }
   0x3   :  { %s215_s19 = scalar_lea.vmem %s19_s16, 128  ;;  %p220_p1 = scmp.lt.s32.totalorder %s19_s16, %s19_s16 }
   0x4   :  { %p216_p0 = scmp.ne.s32.totalorder %s19_s16, %s215_s19  ;;  %p221_p2 = scmp.lt.s32.totalorder %s215_s19, %s215_s19 }
   0x6   :  { %p222_p3 = por %p221_p2, %p220_p1 }
   0x8   :  { %p223_p4 = pnand %p222_p3, %p216_p0 }
   0xa   :  { %226 = shalt.err (!%p223_p4)
}
   0xb   :  { %21 = dma.hbm_to_vmem [thread:$0]  %s301_s0, 128, %s19_s16, [#allocation3]  }
   0xc   :  { %s235_s22 = scalar_lea.vmem %s29_s18, 64  ;;  %p240_p6 = scmp.lt.s32.totalorder %s29_s18, %s29_s18 }
   0xd   :  { %p236_p5 = scmp.ne.s32.totalorder %s29_s18, %s235_s22  ;;  %p241_p7 = scmp.lt.s32.totalorder %s235_s22, %s235_s22 }
   0xf   :  { %p242_p8 = por %p241_p7, %p240_p6 }
  0x11   :  { %p243_p9 = pnand %p242_p8, %p236_p5 }
  0x13   :  { %246 = shalt.err (!%p243_p9)
}
  0x14   :  { %31 = dma.hbm_to_vmem [thread:$0]  %s302_s1, 64, %s29_s18, [#allocation5]  }
  0x15   :  { %247 = dma.done.wait [#allocation3], 128  }
  0x16   :  { %248 = vsyncadd [#allocation3], 4294967168 }
  0x17   :  { %249 = dma.done.wait [#allocation5], 64  }
  0x18   :  { %250 = vsyncadd [#allocation5], 4294967232  ;;  %v253_v0 = vmov 0.0   ;;  %vm254_vm0 = vmmov 0   ;;  %vm49_vm1 = vcmask 261120   ;;  %v40_v2 = vld [vmem:[#allocation2] sm:$0xff]  ;;  %v126_v8 = vlaneseq }
  0x19   :  { %194 = vmatprep.subr.mxu0 %v253_v0  ;;  %196 = vmatprep.mubr.msk.f32.mxu0 %vm254_vm0, %v253_v0  ;;  %v41_v1 = vld [vmem:[#allocation4] sm:$0xf]  ;;  %v188_v3 = vld [vmem:[%s303_s2] ss:$0 sm:$0xff]  ;;  %vm128_vm2 = vcmask 31744  }
  0x1a   :  { %195 = vmatpush3.xpose.msk.msra.mxu0 %vm49_vm1, %v41_v1  ;;  %v127_v9 = vand.u32 127, %v126_v8  ;;  %v160_v36 = vshrl.u32 %v126_v8, 7 }
  0x1c   :  { %vm175_vm6 = vcmp.eq.s32.totalorder %v160_v36, 0 }
  0x1d   :  { %197 = vmatmul.mubr.msk.f32.vlgmr.msra.gmra.mxu0 %vm49_vm1, %v40_v2 }
  0xdd   :  { %v122_v4 = vpop.f32.mrf.mxu0 }
  0xde   :  { %v123_v5 = vadd.f32 %v188_v3, %v122_v4 }
  0xdf   :  { %v198_v6 = vpop.f32.mrf.mxu0 }
  0xe0   :  { %v129_v7 = vsel %vm128_vm2, %v123_v5, -inf }
  0xe1   :  { %130 = vmax.xlane.f32.xlu0 %v129_v7 }
 0x16a   :  { %v131_v10 = vpop.xlane.xlu0 %130 }
 0x16b   :  { %vm132_vm3 = vcmp.eq.f32.partialorder %v123_v5, %v131_v10  ;;  %v152_v11 = vsub.f32 %v123_v5, %v131_v10 }
 0x16c   :  { %v133_v12 = vsel %vm132_vm3, %v127_v9, 4 }
 0x16d   :  { %v153_v13 = vmul.f32 1.442695, %v152_v11  ;;  %v134_v14 = vsel %vm128_vm2, %v133_v12, 2147483647 }
 0x16e   :  { %v136_v15 = vshra.s32 %v134_v14, 16  ;;  %v135_v19 = vand.u32 65535, %v134_v14 }
 0x16f   :  { %203 = vpow2.f32 %v153_v13 }
 0x170   :  { %v138_v16 = vcvt.s32.f32 %v136_v15  ;;  %v137_v21 = vcvt.s32.f32 %v135_v19 }
 0x172   :  { %139 = vmin.xlane.f32.xlu0 %v138_v16 }
 0x17c   :  { %v204_v17 = vpop.eup %203 }
 0x17d   :  { %v155_v18 = vsel %vm128_vm2, %v204_v17, 0.0 }
 0x17e   :  { %156 = vadd.xlane.f32.xlu1 %v155_v18 }
 0x1fb   :  { %v140_v20 = vpop.xlane.xlu0 %139 }
 0x1fc   :  { %vm141_vm4 = vcmp.eq.f32.partialorder %v138_v16, %v140_v20  ;;  %v146_v24 = vcvt.f32.s32 %v140_v20 }
 0x1fd   :  { %v142_v22 = vsel %vm141_vm4, %v137_v21, inf }
 0x1fe   :  { %143 = vmin.xlane.f32.xlu1 %v142_v22  ;;  %v147_v26 = vshll.u32 %v146_v24, 16 }
 0x207   :  { %v157_v23 = vpop.xlane.xlu1 %156 }
 0x208   :  { %205 = vrcp.f32 %v157_v23 }
 0x215   :  { %v206_v29 = vpop.eup %205 }
 0x287   :  { %v144_v25 = vpop.xlane.xlu1 %143 }
 0x288   :  { %v145_v27 = vcvt.f32.s32 %v144_v25 }
 0x28a   :  { %v148_v28 = vadd.s32 %v147_v26, %v145_v27 }
 0x28c   :  { %vm149_vm5 = vcmp.eq.s32.totalorder %v127_v9, %v148_v28 }
 0x28d   :  { %v191_v30 = vsel %vm149_vm5, 1.0, %v253_v0 }
 0x28e   :  { %v165_v31 = vmul.f32 %v206_v29, %v191_v30 }
 0x290   :  { %167 = vst.msk [vmem:[%s304_s3] sm:$0xff] %vm128_vm2, %v165_v31  ;;  %v168_v32 = vsel %vm128_vm2, %v165_v31, 0.0 }
 0x291   :  { %v169_v33 = vrot.slane %v168_v32, 4 }
 0x293   :  { %v170_v34 = vadd.f32 %v169_v33, %v168_v32 }
 0x295   :  { %v171_v35 = vrot.slane %v170_v34, 2 }
 0x297   :  { %v172_v37 = vadd.f32 %v171_v35, %v170_v34 }
 0x299   :  { %v173_v38 = vrot.slane %v172_v37, 1 }
 0x29b   :  { %v174_v39 = vadd.f32 %v173_v38, %v172_v37 }
 0x29d   :  { %v176_v40 = vsel %vm175_vm6, %v174_v39, 0.0 }
 0x29e   :  { %177 = vst.msk [vmem:[%s305_s4] sm:$0xff] %vm128_vm2, %v176_v40 }
 0x29f   :  { %186 = vsyncpa [#allocation3], 1 }
 0x2a0   :  { %187 = vsyncpa [#allocation5], 1 }

</bundles_post_ra>
